<compile_context>
chip_gen: v5e
topology: v5e:2x2
jax: 0.10.0
libtpu: 0.0.40
codegen_flags: <defaults>
</compile_context>

<pallas_src>
import jax
import jax.numpy as jnp
from jax.experimental import pallas as pl
from jax.experimental.pallas import tpu as pltpu

IN_DIM = 512  # CLIP embedding dim, fixed by the module.


def _round_up(x, m):
    return (x + m - 1) // m * m


def _mlp_kernel(x_ref, w1_ref, b1_ref, w2_ref, b2_ref, o_ref):
    # In-kernel cast to the MXU dtype (VPU op, hidden under the x DMA).
    x = x_ref[...].astype(w1_ref.dtype)
    # Layer 1: (TB, D) @ (D, Hp) on the MXU, f32 accumulation.
    h = jnp.dot(x, w1_ref[...], preferred_element_type=jnp.float32)
    # Bias + ReLU on the f32 accumulator (VPU); b1 is (1, Hp) -> broadcasts.
    h = jnp.maximum(h + b1_ref[...], 0.0)
    # Layer 2: (TB, Hp) @ (Hp, C), f32 accumulation.
    out = jnp.dot(h.astype(w2_ref.dtype), w2_ref[...],
                  preferred_element_type=jnp.float32)
    # Store directly in the output dtype (x.dtype); last dim == full C, so this
    # is a lean (masked) store with no padded-lane HBM writeback.
    o_ref[...] = (out + b2_ref[...]).astype(o_ref.dtype)


def prepare_params(w1, b1, w2, b2, *, mm_dtype=jnp.bfloat16):
    """One-time padding / casting of the weights (hoisted out of the forward path).

    w1 : (512, H)  (transposed vs torch's (H, 512)),  b1: (1, H)
    w2 : (H, C)    (transposed vs torch's (C, H)),    b2: (1, C)
    Returns (w1_p, b1_p, w2_p, b2_p) with H zero-padded to a multiple of 128.
    """
    D, H = w1.shape
    assert D == IN_DIM, f"expected feature dim {IN_DIM}, got {D}"
    C = w2.shape[1]
    Hp = _round_up(H, 128)  # lane-dense hidden dim for the MXU / vregs

    w1_p = jnp.zeros((D, Hp), mm_dtype).at[:, :H].set(w1.astype(mm_dtype))
    b1_p = jnp.zeros((1, Hp), jnp.float32).at[:, :H].set(b1.astype(jnp.float32))
    w2_p = jnp.zeros((Hp, C), mm_dtype).at[:H, :].set(w2.astype(mm_dtype))
    b2_p = b2.astype(jnp.float32).reshape(1, C)
    return w1_p, b1_p, w2_p, b2_p


def clip2mlp_forward(x, params, *, block_b=1024):
    """Fused Linear->ReLU->Linear.

    x      : (B, 512) in any float dtype (f32/bf16; narrower is cheaper — it is
             the dominant HBM term).
    params : output of prepare_params().
    returns (B, C) in x.dtype.
    """
    w1_p, b1_p, w2_p, b2_p = params
    B, D = x.shape
    assert D == IN_DIM, f"expected feature dim {IN_DIM}, got {D}"
    Hp = w1_p.shape[1]
    C = w2_p.shape[1]

    # Batch tile: multiple of 8 sublanes.  For mid-sized B pick ~B/2 so the grid
    # has >=2 steps (both v7x TensorCores engage); cap at block_b so large B gets
    # pipeline depth while staying far inside VMEM on every generation.
    TB = max(8, min(block_b, _round_up(-(-B // 2), 8)))
    nb = pl.cdiv(B, TB)  # ragged last tile handled by Pallas (rows independent)

    out_dtype = x.dtype
    mm_itemsize = jnp.dtype(w1_p.dtype).itemsize
    flops = 2 * B * (D * Hp + Hp * C)
    bytes_accessed = (B * D * jnp.dtype(x.dtype).itemsize       # x (read once)
                      + D * Hp * mm_itemsize                    # w1 (resident)
                      + Hp * C * mm_itemsize                    # w2 (resident)
                      + (Hp + C) * 4                            # biases (f32)
                      + B * C * jnp.dtype(out_dtype).itemsize)  # output

    out = pl.pallas_call(
        _mlp_kernel,
        out_shape=jax.ShapeDtypeStruct((B, C), out_dtype),
        grid_spec=pltpu.PrefetchScalarGridSpec(
            num_scalar_prefetch=0,
            grid=(nb,),
            in_specs=[
                # Batch-tiled input: new tile per grid step (double-buffered).
                pl.BlockSpec((TB, D), lambda i: (i, 0)),
                # Weights / biases: constant block index -> VMEM-resident, DMA'd once.
                pl.BlockSpec((D, Hp), lambda i: (0, 0)),
                pl.BlockSpec((1, Hp), lambda i: (0, 0)),
                pl.BlockSpec((Hp, C), lambda i: (0, 0)),
                pl.BlockSpec((1, C), lambda i: (0, 0)),
            ],
            # Last dim == full array dim C -> satisfies the (8,128) rule with no
            # padded-lane writeback.
            out_specs=pl.BlockSpec((TB, C), lambda i: (i, 0)),
        ),
        compiler_params=pltpu.CompilerParams(
            # Batch tiles are independent -> shard across v7x's 2 TensorCores
            # (harmless on single-TC v5e/v6e).
            dimension_semantics=("parallel",),
            # TB=1024 f32 x-tile (2 MiB) x2 buffers + out + weights + f32 hidden
            # activations is well under this on v5e/v6e/v7x.
            vmem_limit_bytes=32 * 1024 * 1024,
        ),
        cost_estimate=pl.CostEstimate(
            flops=flops, transcendentals=0, bytes_accessed=bytes_accessed),
    )(x, w1_p, b1_p, w2_p, b2_p)

    return out


def init_params(key, hidden_dim, num_classes, in_dim=IN_DIM, dtype=jnp.float32):
    """Deterministic init mimicking nn.Linear's U(-1/sqrt(fan_in), 1/sqrt(fan_in))."""
    k1, k2, k3, k4 = jax.random.split(key, 4)
    bound1 = 1.0 / jnp.sqrt(in_dim)
    bound2 = 1.0 / jnp.sqrt(hidden_dim)
    # Stored already transposed relative to torch: (in, out).
    w1 = jax.random.uniform(k1, (in_dim, hidden_dim), dtype, -bound1, bound1)
    b1 = jax.random.uniform(k2, (1, hidden_dim), dtype, -bound1, bound1)
    w2 = jax.random.uniform(k3, (hidden_dim, num_classes), dtype, -bound2, bound2)
    b2 = jax.random.uniform(k4, (1, num_classes), dtype, -bound2, bound2)
    return w1, b1, w2, b2


def reference_forward(x, w1, b1, w2, b2):
    """Pure-JAX f32 reference (identical math to the PyTorch module)."""
    h = jnp.maximum(x @ w1 + b1, 0.0)
    return h @ w2 + b2


if __name__ == "__main__":
    key = jax.random.PRNGKey(0)
    kx, kp = jax.random.split(key)

    batch = 8
    hidden_dim = 32
    num_classes = 8

    x = jax.random.normal(kx, (batch, IN_DIM), dtype=jnp.float32)
    w1, b1, w2, b2 = init_params(kp, hidden_dim, num_classes)

    # One-time weight preparation (hoisted out of the per-call forward path).
    params = prepare_params(w1, b1, w2, b2)

    out = clip2mlp_forward(x, params)
    out = jax.block_until_ready(out)

    ref = reference_forward(x, w1, b1, w2, b2)
    assert out.shape == (batch, num_classes)
    assert out.dtype == x.dtype
    # bf16 MXU inputs with f32 accumulation -> relaxed tolerance vs f32 ref.
    assert jnp.allclose(out, ref, atol=3e-2, rtol=3e-2), "mismatch vs reference"

    print("KERNEL_OK")
</pallas_src>

<mosaic_0001>
module attributes {stable_mosaic.version = 11 : i64} {
  func.func @_mlp_kernel(%arg0: i32, %arg1: memref<8x512xf32, #tpu.memory_space<vmem>>, %arg2: memref<512x128xbf16, #tpu.memory_space<vmem>>, %arg3: memref<1x128xf32, #tpu.memory_space<vmem>>, %arg4: memref<128x8xbf16, #tpu.memory_space<vmem>>, %arg5: memref<1x8xf32, #tpu.memory_space<vmem>>, %arg6: memref<8x8xf32, #tpu.memory_space<vmem>>) attributes {dimension_semantics = [#tpu.dimension_semantics<parallel>], iteration_bounds = array<i64: 1>, scalar_prefetch = 0 : i64, scratch_operands = 0 : i64, tpu.core_type = #tpu.core_type<tc>, window_params = [{transform_indices = @transform_0, window_bounds = array<i64: 8, 512>}, {pipeline_mode = #tpu.pipeline_mode<synchronous>, transform_indices = @transform_1, window_bounds = array<i64: 512, 128>}, {pipeline_mode = #tpu.pipeline_mode<synchronous>, transform_indices = @transform_2, window_bounds = array<i64: 1, 128>}, {pipeline_mode = #tpu.pipeline_mode<synchronous>, transform_indices = @transform_3, window_bounds = array<i64: 128, 8>}, {pipeline_mode = #tpu.pipeline_mode<synchronous>, transform_indices = @transform_4, window_bounds = array<i64: 1, 8>}, {transform_indices = @transform_5, window_bounds = array<i64: 8, 8>}]} {
    %c0 = arith.constant 0 : index
    %c0_0 = arith.constant 0 : index
    %0 = vector.load %arg1[%c0, %c0_0] : memref<8x512xf32, #tpu.memory_space<vmem>>, vector<8x512xf32>
    %1 = arith.truncf %0 : vector<8x512xf32> to vector<8x512xbf16>
    %c0_1 = arith.constant 0 : index
    %c0_2 = arith.constant 0 : index
    %2 = vector.load %arg2[%c0_1, %c0_2] : memref<512x128xbf16, #tpu.memory_space<vmem>>, vector<512x128xbf16>
    %cst = arith.constant dense<0.000000e+00> : vector<8x128xf32>
    %3 = tpu.matmul %1, %2, %cst {dimension_numbers = #tpu.dot_dimension_numbers<[1], [0], [0], [1], [0, 0, 1, 1], [], []>} : vector<8x512xbf16>, vector<512x128xbf16>, vector<8x128xf32> -> vector<8x128xf32>
    %c0_3 = arith.constant 0 : index
    %c0_4 = arith.constant 0 : index
    %4 = vector.load %arg3[%c0_3, %c0_4] : memref<1x128xf32, #tpu.memory_space<vmem>>, vector<1x128xf32>
    %5 = vector.broadcast %4 : vector<1x128xf32> to vector<8x128xf32>
    %6 = arith.addf %3, %5 : vector<8x128xf32>
    %cst_5 = arith.constant 0.000000e+00 : f32
    %7 = vector.broadcast %cst_5 : f32 to vector<8x128xf32>
    %8 = arith.maximumf %6, %7 : vector<8x128xf32>
    %9 = arith.truncf %8 : vector<8x128xf32> to vector<8x128xbf16>
    %c0_6 = arith.constant 0 : index
    %c0_7 = arith.constant 0 : index
    %10 = vector.load %arg4[%c0_6, %c0_7] : memref<128x8xbf16, #tpu.memory_space<vmem>>, vector<128x8xbf16>
    %cst_8 = arith.constant dense<0.000000e+00> : vector<8x8xf32>
    %11 = tpu.matmul %9, %10, %cst_8 {dimension_numbers = #tpu.dot_dimension_numbers<[1], [0], [0], [1], [0, 0, 1, 1], [], []>} : vector<8x128xbf16>, vector<128x8xbf16>, vector<8x8xf32> -> vector<8x8xf32>
    %c0_9 = arith.constant 0 : index
    %c0_10 = arith.constant 0 : index
    %12 = vector.load %arg5[%c0_9, %c0_10] : memref<1x8xf32, #tpu.memory_space<vmem>>, vector<1x8xf32>
    %13 = vector.broadcast %12 : vector<1x8xf32> to vector<8x8xf32>
    %14 = arith.addf %11, %13 : vector<8x8xf32>
    %c0_11 = arith.constant 0 : index
    %c0_12 = arith.constant 0 : index
    %15 = vector.load %arg6[%c0_11, %c0_12] : memref<8x8xf32, #tpu.memory_space<vmem>>, vector<8x8xf32>
    tpu.vector_store %arg6[%c0_11, %c0_12], %14 {strides = array<i32>} : memref<8x8xf32, #tpu.memory_space<vmem>>, vector<8x8xf32>,
    return
  }
  func.func @transform_0(%arg0: i32) -> (i32, i32) {
    %c0_i32 = arith.constant 0 : i32
    %c0_i32_0 = arith.constant 0 : i32
    return %arg0, %c0_i32 : i32, i32
  }
  func.func @transform_1(%arg0: i32) -> (i32, i32) {
    %c0_i32 = arith.constant 0 : i32
    %c0_i32_0 = arith.constant 0 : i32
    %c0_i32_1 = arith.constant 0 : i32
    return %c0_i32, %c0_i32_0 : i32, i32
  }
  func.func @transform_2(%arg0: i32) -> (i32, i32) {
    %c0_i32 = arith.constant 0 : i32
    %c0_i32_0 = arith.constant 0 : i32
    %c0_i32_1 = arith.constant 0 : i32
    return %c0_i32, %c0_i32_0 : i32, i32
  }
  func.func @transform_3(%arg0: i32) -> (i32, i32) {
    %c0_i32 = arith.constant 0 : i32
    %c0_i32_0 = arith.constant 0 : i32
    %c0_i32_1 = arith.constant 0 : i32
    return %c0_i32, %c0_i32_0 : i32, i32
  }
  func.func @transform_4(%arg0: i32) -> (i32, i32) {
    %c0_i32 = arith.constant 0 : i32
    %c0_i32_0 = arith.constant 0 : i32
    %c0_i32_1 = arith.constant 0 : i32
    return %c0_i32, %c0_i32_0 : i32, i32
  }
  func.func @transform_5(%arg0: i32) -> (i32, i32) {
    %c0_i32 = arith.constant 0 : i32
    %c0_i32_0 = arith.constant 0 : i32
    return %arg0, %c0_i32 : i32, i32
  }
}

</mosaic_0001>

<bundles_post_ra>
// kernel: tpu_custom_call.1
= control target key start
LH: loop header
LB: loop body
LE: loop exit
PB: predicated region body
PF: predicated region fallthrough
CT: control target
= control target key end

     0   :  { %10 = vsyncpa [#allocation3], 0  ;;  %s799_s0 = inlined_call_operand.vmem [shape: f32[8,512], index: 0, kind: input, shape index: {}]   ;;  %s800_s1 = inlined_call_operand.hbm [shape: bf16[512,128], index: 1, kind: input, shape index: {}]   ;;  %s801_s2 = inlined_call_operand.vmem [shape: f32[1,128], index: 2, kind: input, shape index: {}]   ;;  %s802_s3 = inlined_call_operand.vmem [shape: bf16[128,8], index: 3, kind: input, shape index: {}]   ;;  %s803_s4 = inlined_call_operand.vmem [shape: f32[1,8], index: 4, kind: input, shape index: {}]   ;;  %s804_s5 = inlined_call_operand.hbm [shape: f32[8,8], index: 5, kind: output, shape index: {}]  }
   0x1   :  { %11 = vsyncpa [#allocation4], 0  ;;  %s18_s20 = sshll.u32 %s800_s1, 4  ;;  %s717_s21 = smov [#allocation2]   ;;  %s19_s20 = int_to_ptr.hbm [resolvable:$true] %s18_s20 }
   0x2   :  { %s20_s22 = sshll.u32 %s717_s21, 4  ;;  %s718_s23 = smov 64   ;;  %s21_s22 = int_to_ptr.vmem [resolvable:$true] %s20_s22 }
   0x3   :  { %s719_s24 = smov 4  }
   0x4   :  { %26 = dma.hbm_to_vmem [thread:$0]  %s19_s20, 4096, %s21_s22, [#allocation3], %s718_s23, %s718_s23, %s719_s24  }
   0x5   :  { %713 = dma.done.wait [#allocation3], 4096  }
   0x6   :  { %714 = vsyncadd [#allocation3], 4294963200  ;;  %v626_v0 = vld [vmem:[#allocation2 + $0x38] sm:$0xff]  ;;  %v625_v4 = vld [vmem:[#allocation2 + $0x30] sm:$0xff]  ;;  %s449_s27 = sshll.u32 %s804_s5, 4  ;;  %vm440_vm0 = vcmask 64512   ;;  %s450_s27 = int_to_ptr.hbm [resolvable:$true] %s449_s27 }
   0x7   :  { %v634_v1 = vld [vmem:[#allocation2 + $0x78] sm:$0xff]  ;;  %305 = vmatpush.bf16.msra.mxu0 %v626_v0  ;;  %v633_v5 = vld [vmem:[#allocation2 + $0x70] sm:$0xff]  ;;  %v624_v8 = vld [vmem:[#allocation2 + $0x28] sm:$0xff] }
   0x8   :  { %v642_v2 = vld [vmem:[#allocation2 + $0xb8] sm:$0xff]  ;;  %318 = vmatpush.bf16.msra.mxu1 %v634_v1  ;;  %v641_v6 = vld [vmem:[#allocation2 + $0xb0] sm:$0xff]  ;;  %v632_v9 = vld [vmem:[#allocation2 + $0x68] sm:$0xff] }
   0x9   :  { %v650_v3 = vld [vmem:[#allocation2 + $0xf8] sm:$0xff]  ;;  %331 = vmatpush.bf16.msra.mxu2 %v642_v2  ;;  %v649_v7 = vld [vmem:[#allocation2 + $0xf0] sm:$0xff]  ;;  %v640_v10 = vld [vmem:[#allocation2 + $0xa8] sm:$0xff] }
   0xa   :  { %344 = vmatpush.bf16.msra.mxu3 %v650_v3  ;;  %v648_v11 = vld [vmem:[#allocation2 + $0xe8] sm:$0xff]  ;;  %v623_v12 = vld [vmem:[#allocation2 + $0x20] sm:$0xff]  ;;  %v622_v16 = vld [vmem:[#allocation2 + $0x18] sm:$0xff] }
   0xb   :  { %306 = vmatpush.bf16.msra.mxu0 %v625_v4  ;;  %v631_v13 = vld [vmem:[#allocation2 + $0x60] sm:$0xff]  ;;  %v630_v17 = vld [vmem:[#allocation2 + $0x58] sm:$0xff]  ;;  %v621_v20 = vld [vmem:[#allocation2 + $0x10] sm:$0xff] }
   0xc   :  { %319 = vmatpush.bf16.msra.mxu1 %v633_v5  ;;  %v639_v14 = vld [vmem:[#allocation2 + $0xa0] sm:$0xff]  ;;  %v638_v18 = vld [vmem:[#allocation2 + $0x98] sm:$0xff]  ;;  %v629_v21 = vld [vmem:[#allocation2 + $0x50] sm:$0xff] }
   0xd   :  { %332 = vmatpush.bf16.msra.mxu2 %v641_v6  ;;  %v647_v15 = vld [vmem:[#allocation2 + $0xe0] sm:$0xff]  ;;  %v646_v19 = vld [vmem:[#allocation2 + $0xd8] sm:$0xff]  ;;  %v637_v22 = vld [vmem:[#allocation2 + $0x90] sm:$0xff] }
   0xe   :  { %345 = vmatpush.bf16.msra.mxu3 %v649_v7  ;;  %v645_v23 = vld [vmem:[#allocation2 + $0xd0] sm:$0xff]  ;;  %v620_v24 = vld [vmem:[#allocation2 + $0x8] sm:$0xff]  ;;  %v619_v28 = vld [vmem:[#allocation2] sm:$0xff] }
   0xf   :  { %307 = vmatpush.bf16.msra.mxu0 %v624_v8  ;;  %v628_v25 = vld [vmem:[#allocation2 + $0x48] sm:$0xff]  ;;  %v627_v29 = vld [vmem:[#allocation2 + $0x40] sm:$0xff]  ;;  %v39_v34 = vld [vmem:[%s799_s0 + $0x10] sm:$0xff] }
  0x10   :  { %320 = vmatpush.bf16.msra.mxu1 %v632_v9  ;;  %v636_v26 = vld [vmem:[#allocation2 + $0x88] sm:$0xff]  ;;  %v635_v30 = vld [vmem:[#allocation2 + $0x80] sm:$0xff]  ;;  %v40_v35 = vld [vmem:[%s799_s0 + $0x18] sm:$0xff]  ;;  %v43_v39 = vpack.c.bf16 %v39_v34, %v39_v34 }
  0x11   :  { %333 = vmatpush.bf16.msra.mxu2 %v640_v10  ;;  %v644_v27 = vld [vmem:[#allocation2 + $0xc8] sm:$0xff]  ;;  %v37_v31 = vld [vmem:[%s799_s0] sm:$0xff]  ;;  %v658_v36 = vld [vmem:[%s802_s3 + $0x38] sm:$0xff]  ;;  %v44_v40 = vpack.c.bf16 %v40_v35, %v40_v35 }
  0x12   :  { %346 = vmatpush.bf16.msra.mxu3 %v648_v11  ;;  %v38_v32 = vld [vmem:[%s799_s0 + $0x8] sm:$0xff]  ;;  %v643_v33 = vld [vmem:[#allocation2 + $0xc0] sm:$0xff]  ;;  %v41_v37 = vpack.c.bf16 %v37_v31, %v37_v31  ;;  %v657_v41 = vld [vmem:[%s802_s3 + $0x30] sm:$0xff] }
  0x13   :  { %308 = vmatpush.bf16.msra.mxu0 %v623_v12  ;;  %v42_v38 = vpack.c.bf16 %v38_v32, %v38_v32  ;;  %v656_v42 = vld [vmem:[%s802_s3 + $0x28] sm:$0xff]  ;;  %v655_v43 = vld [vmem:[%s802_s3 + $0x20] sm:$0xff]  ;;  %v654_v44 = vld [vmem:[%s802_s3 + $0x18] sm:$0xff] }
  0x14   :  { %321 = vmatpush.bf16.msra.mxu1 %v631_v13  ;;  %v653_v45 = vld [vmem:[%s802_s3 + $0x10] sm:$0xff]  ;;  %v652_v46 = vld [vmem:[%s802_s3 + $0x8] sm:$0xff]  ;;  %v651_v47 = vld [vmem:[%s802_s3] sm:$0xff] }
  0x15   :  { %334 = vmatpush.bf16.msra.mxu2 %v639_v14  ;;  %v663_v48 = vld [vmem:[%s801_s2] ss:$0 sm:$0xff]  ;;  %s720_s2 = smov [#allocation5]  }
  0x16   :  { %347 = vmatpush.bf16.msra.mxu3 %v647_v15  ;;  %v664_v63 = vld [vmem:[%s803_s4] ss:$0 sm:$0xff]  ;;  %s447_s1 = sshll.u32 %s720_s2, 4  ;;  %s448_s1 = int_to_ptr.vmem [resolvable:$true] %s447_s1 }
  0x17   :  { %309 = vmatpush.bf16.msra.mxu0 %v622_v16 }
  0x18   :  { %322 = vmatpush.bf16.msra.mxu1 %v630_v17 }
  0x19   :  { %335 = vmatpush.bf16.msra.mxu2 %v638_v18 }
  0x1a   :  { %348 = vmatpush.bf16.msra.mxu3 %v646_v19 }
  0x1b   :  { %310 = vmatpush.bf16.msra.mxu0 %v621_v20 }
  0x1c   :  { %323 = vmatpush.bf16.msra.mxu1 %v629_v21 }
  0x1d   :  { %336 = vmatpush.bf16.msra.mxu2 %v637_v22 }
  0x1e   :  { %349 = vmatpush.bf16.msra.mxu3 %v645_v23 }
  0x1f   :  { %311 = vmatpush.bf16.msra.mxu0 %v620_v24 }
  0x20   :  { %324 = vmatpush.bf16.msra.mxu1 %v628_v25 }
  0x21   :  { %337 = vmatpush.bf16.msra.mxu2 %v636_v26 }
  0x22   :  { %350 = vmatpush.bf16.msra.mxu3 %v644_v27 }
  0x23   :  { %312 = vmatpush.bf16.msra.mxu0 %v619_v28 }
  0x24   :  { %325 = vmatpush.bf16.msra.mxu1 %v627_v29 }
  0x25   :  { %338 = vmatpush.bf16.msra.mxu2 %v635_v30 }
  0x26   :  { %351 = vmatpush.bf16.msra.mxu3 %v643_v33  ;;  %313 = vmatmul.bf16.vlgmr.msra.gmra.mxu0 %v41_v37 }
  0x27   :  { %427 = vmatpush.bf16.msrb.mxu0 %v658_v36  ;;  %326 = vmatmul.bf16.vlgmr.msra.gmra.mxu1 %v42_v38 }
  0x28   :  { %339 = vmatmul.bf16.vlgmr.msra.gmra.mxu2 %v43_v39 }
  0x29   :  { %352 = vmatmul.bf16.vlgmr.msra.gmra.mxu3 %v44_v40 }
  0x2b   :  { %428 = vmatpush.bf16.msrb.mxu0 %v657_v41 }
  0x2f   :  { %429 = vmatpush.bf16.msrb.mxu0 %v656_v42 }
  0x33   :  { %430 = vmatpush.bf16.msrb.mxu0 %v655_v43 }
  0x37   :  { %431 = vmatpush.bf16.msrb.mxu0 %v654_v44 }
  0x3b   :  { %432 = vmatpush.bf16.msrb.mxu0 %v653_v45 }
  0x3f   :  { %433 = vmatpush.bf16.msrb.mxu0 %v652_v46 }
  0x43   :  { %434 = vmatpush.bf16.msrb.mxu0 %v651_v47 }
  0xa3   :  { %v314_v49 = vpop.f32.mrf.mxu0 }
  0xa4   :  { %v327_v50 = vpop.f32.mrf.mxu1  ;;  %v315_v51 = vadd.f32 %v663_v48, %v314_v49 }
  0xa6   :  { %v328_v52 = vadd.f32 %v327_v50, %v315_v51 }
  0xab   :  { %v340_v53 = vpop.f32.mrf.mxu2  ;;  %v316_v56 = vpop.f32.mrf.mxu0 }
  0xac   :  { %v353_v54 = vpop.f32.mrf.mxu3  ;;  %v341_v55 = vadd.f32 %v340_v53, %v328_v52  ;;  %v329_v57 = vpop.f32.mrf.mxu1 }
  0xae   :  { %v354_v58 = vadd.f32 %v353_v54, %v341_v55 }
  0xb0   :  { %v357_v59 = vmax.f32 %v354_v58, 0.0 }
  0xb2   :  { %v358_v60 = vpack.c.bf16 %v357_v59, %v357_v59 }
  0xb3   :  { %v342_v61 = vpop.f32.mrf.mxu2 }
  0xb4   :  { %v355_v62 = vpop.f32.mrf.mxu3  ;;  %435 = vmatmul.bf16.vlgmr.msrb.gmra.mxu0 %v358_v60 }
 0x131   :  { %v436_v0 = vpop.f32.mrf.mxu0 }
 0x132   :  { %v437_v1 = vadd.f32 %v664_v63, %v436_v0 }
 0x134   :  { %441 = vst.msk [vmem:[#allocation5] sm:$0xff] %vm440_vm0, %v437_v1 }
 0x135   :  { %452 = dma.vmem_to_hbm [thread:$0]  %s448_s1, 128, %s450_s27, [#allocation4]  }
 0x139   :  { %v438_v2 = vpop.f32.mrf.mxu0 }
 0x13a   :  { %715 = dma.done.wait [#allocation4], 128  }
 0x13b   :  { %716 = vsyncadd [#allocation4], 4294967168 }
 0x13c   :  { %457 = vsyncpa [#allocation3], 1 }
 0x13d   :  { %458 = vsyncpa [#allocation4], 1 }

</bundles_post_ra>
